<compile_context>
chip_gen: v6e
topology: v6e:2x2x1
jax: 0.10.0
libtpu: 0.0.40
codegen_flags: <defaults>
</compile_context>

<pallas_src>
import functools

import jax
import jax.numpy as jnp
from jax.experimental import pallas as pl
from jax.experimental.pallas import tpu as pltpu


def _round_up(x: int, m: int) -> int:
    return ((x + m - 1) // m) * m


def _tpu_chip_info():
    """Best-effort (physical VMEM bytes, has-two-TensorCores) query."""
    vmem_cap = None
    try:
        vmem_cap = int(pltpu.get_tpu_info().vmem_capacity_bytes)
    except Exception:
        pass
    kind = ""
    try:
        kind = (jax.devices()[0].device_kind or "").lower()
    except Exception:
        pass
    two_tc = "v7" in kind                       # v7x-class parts: 2 TensorCores per chip
    if vmem_cap is None:
        vmem_cap = 64 * 1024 * 1024 if two_tc else 128 * 1024 * 1024
    return vmem_cap, two_tc


def _pick_c_tile(CP: int, two_tc: bool) -> int:
    """Split channels only on 2-TC parts (megacore 'parallel' sharding) and only when each
    half stays a wide multiple of 128. On single-TC chips a split is pure overhead."""
    if not two_tc:
        return CP
    if CP % 256 != 0 or CP < 512:
        return CP
    return CP // 2


def _dwconv_kernel(x_ref, w_ref, b_ref, o_ref, halo_ref, *, TR, B, K, HALO, HP):
    # x_ref   : (TR, Ct)  current row tile (input dtype)
    # w_ref   : (K, Ct)   f32 depthwise taps (channels-last), resident across row tiles
    # b_ref   : (1, Ct)   f32 bias, resident across row tiles
    # o_ref   : (TR, Ct)  output row tile
    # halo_ref: (HP, Ct)  f32; rows [HP-HALO, HP) hold the causal halo carried across row tiles
    r = pl.program_id(1)

    @pl.when(r == 0)
    def _init_halo():              # start of each channel tile's row sweep: causal zeros
        halo_ref[...] = jnp.zeros(halo_ref.shape, halo_ref.dtype)

    x = x_ref[...].astype(jnp.float32)                   # single load + upcast, stays in vregs
    w = w_ref[...]                                       # (K, Ct)
    xc = jnp.concatenate([halo_ref[...], x], axis=0)     # (HP + TR, Ct); HP is 8-aligned

    # Tap K-1 has zero shift: fuse the bias into its multiply-add.
    acc = x * w[K - 1:K, :] + b_ref[...]
    for k in range(K - 1):                               # K is tiny & static -> unrolled
        s = (K - 1 - k) * B                              # causal shift in flattened rows
        acc = acc + xc[HP - s:HP - s + TR, :] * w[k:k + 1, :]
    o_ref[...] = acc.astype(o_ref.dtype)

    # Carry the last HALO input rows to the next (sequential) row tile.
    # TR < HALO only happens when there is a single row tile, in which case no carry is needed.
    if HALO > 0 and TR >= HALO:
        @pl.when(r != pl.num_programs(1) - 1)
        def _carry():
            halo_ref[pl.ds(HP - HALO, HALO), :] = x[TR - HALO:, :]


def dwise_conv_primer_ez(inp, weight, bias, kernel_size=3, *, row_tile=None, c_tile=None):
    """inp: (L, B, C); weight: (C, 1, K) [PyTorch depthwise Conv1d]; bias: (C,). Returns (L, B, C)."""
    L, B, C = inp.shape
    K = int(kernel_size)
    assert weight.shape == (C, 1, K)
    assert bias.shape == (C,)

    rows = L * B
    HALO = (K - 1) * B                     # causal halo in flattened rows
    HP = max(8, _round_up(HALO, 8))        # sublane-aligned halo scratch height

    # Flatten (L, B) -> rows (free reshape, leading dims collapse). Channels stay on lanes.
    x2 = inp.reshape(rows, C)
    w_t = jnp.transpose(weight[:, 0, :], (1, 0)).astype(jnp.float32)   # (K, C)
    b2 = bias.reshape(1, C).astype(jnp.float32)                        # (1, C)

    # Lane-dense stores: pad channels to a multiple of 128 only when unaligned.
    CP = _round_up(C, 128)
    if CP != C:
        x2 = jnp.pad(x2, ((0, 0), (0, CP - C)))
        w_t = jnp.pad(w_t, ((0, 0), (0, CP - C)))
        b2 = jnp.pad(b2, ((0, 0), (0, CP - C)))

    vmem_cap, two_tc = _tpu_chip_info()
    if two_tc or vmem_cap <= 64 * 1024 * 1024:
        # v7x-class: 64 MiB VMEM per TensorCore, highest HBM BW -> ~4 MiB blocks, 48 MiB scoped.
        vmem_limit = 48 * 1024 * 1024
        target_tile_bytes = 4 * 1024 * 1024
    else:
        # v5e / v6e: 128 MiB physical VMEM -> bigger blocks amortize the per-step overhead.
        vmem_limit = 64 * 1024 * 1024
        target_tile_bytes = 8 * 1024 * 1024

    if c_tile is None:
        c_tile = _pick_c_tile(CP, two_tc)
    grid_c = pl.cdiv(CP, c_tile)

    itemsize = jnp.dtype(inp.dtype).itemsize
    if row_tile is None:
        row_tile = (target_tile_bytes // (c_tile * itemsize)) // 8 * 8
    row_tile = max(int(row_tile), HP, 8)
    if row_tile >= rows:
        row_tile = rows                    # single full block along rows
    grid_r = pl.cdiv(rows, row_tile)

    kernel = functools.partial(_dwconv_kernel, TR=row_tile, B=B, K=K, HALO=HALO, HP=HP)

    # HBM-bound custom call: ~2*K flops/elem, one read + one write of the activations.
    cost = pl.CostEstimate(
        flops=2 * K * rows * CP,
        transcendentals=0,
        bytes_accessed=rows * CP * itemsize * 2 + (K + 1) * CP * 4,
    )

    # NOTE: grid order must stay (channels, rows) with rows innermost & "arbitrary" —
    # the halo carry relies on the row sweep being sequential per channel tile.
    out2 = pl.pallas_call(
        kernel,
        out_shape=jax.ShapeDtypeStruct((rows, CP), inp.dtype),
        grid=(grid_c, grid_r),
        in_specs=[
            pl.BlockSpec((row_tile, c_tile), lambda c, r: (r, c)),
            pl.BlockSpec((K, c_tile), lambda c, r: (0, c)),   # resident across row tiles
            pl.BlockSpec((1, c_tile), lambda c, r: (0, c)),   # resident across row tiles
        ],
        out_specs=pl.BlockSpec((row_tile, c_tile), lambda c, r: (r, c)),
        scratch_shapes=[pltpu.VMEM((HP, c_tile), jnp.float32)],
        compiler_params=pltpu.CompilerParams(
            dimension_semantics=("parallel", "arbitrary"),
            vmem_limit_bytes=vmem_limit,
        ),
        cost_estimate=cost,
    )(x2, w_t, b2)

    if CP != C:
        out2 = out2[:, :C]
    return out2.reshape(L, B, C)


if __name__ == "__main__":
    d_model = 16
    kernel_size = 3
    L, B = 8, 2
    C = 3 * d_model

    key = jax.random.PRNGKey(0)
    k1, k2, k3 = jax.random.split(key, 3)
    inp = jax.random.normal(k1, (L, B, C), dtype=jnp.float32)
    # Parameter shapes follow nn.Conv1d(C, C, K, groups=C): weight (C, 1, K), bias (C,).
    weight = 0.1 * jax.random.normal(k2, (C, 1, kernel_size), dtype=jnp.float32)
    bias = 0.1 * jax.random.normal(k3, (C,), dtype=jnp.float32)

    # Pure-JAX reference (causal depthwise conv + bias).
    xp = jnp.pad(inp, ((kernel_size - 1, 0), (0, 0), (0, 0)))
    ref = bias[None, None, :]
    for k in range(kernel_size):
        ref = ref + xp[k:k + L] * weight[:, 0, k][None, None, :]

    # 1) Forced small row tile -> multiple row tiles, exercises halo zero-init + carry path.
    out_tiled = jax.block_until_ready(
        dwise_conv_primer_ez(inp, weight, bias, kernel_size, row_tile=8))
    # 2) Default auto-tiling path (generation-aware sizing, channel padding to 128).
    out_auto = jax.block_until_ready(
        dwise_conv_primer_ez(inp, weight, bias, kernel_size))

    assert out_tiled.shape == (L, B, C)
    assert jnp.allclose(out_tiled, ref, atol=1e-5), float(jnp.max(jnp.abs(out_tiled - ref)))
    assert jnp.allclose(out_auto, ref, atol=1e-5), float(jnp.max(jnp.abs(out_auto - ref)))
    print("KERNEL_OK")
</pallas_src>

<mosaic_0001>
module attributes {stable_mosaic.version = 11 : i64} {
  func.func @_dwconv_kernel(%arg0: i32, %arg1: i32, %arg2: memref<8x128xf32, #tpu.memory_space<vmem>>, %arg3: memref<3x128xf32, #tpu.memory_space<vmem>>, %arg4: memref<1x128xf32, #tpu.memory_space<vmem>>, %arg5: memref<8x128xf32, #tpu.memory_space<vmem>>, %arg6: memref<8x128xf32, #tpu.memory_space<vmem>>) attributes {dimension_semantics = [#tpu.dimension_semantics<parallel>, #tpu.dimension_semantics<arbitrary>], iteration_bounds = array<i64: 1, 2>, scalar_prefetch = 0 : i64, scratch_operands = 1 : i64, tpu.core_type = #tpu.core_type<tc>, window_params = [{transform_indices = @transform_0, window_bounds = array<i64: 8, 128>}, {transform_indices = @transform_1, window_bounds = array<i64: 3, 128>}, {transform_indices = @transform_2, window_bounds = array<i64: 1, 128>}, {transform_indices = @transform_3, window_bounds = array<i64: 8, 128>}]} {
    %c0_i32 = arith.constant 0 : i32
    %0 = arith.cmpi eq, %arg1, %c0_i32 : i32
    %1 = arith.extui %0 : i1 to i32
    %c0_i32_0 = arith.constant 0 : i32
    %2 = arith.cmpi ne, %1, %c0_i32_0 : i32
    scf.if %2 {
      %cst = arith.constant 0.000000e+00 : f32
      %27 = vector.broadcast %cst : f32 to vector<8x128xf32>
      %c0_11 = arith.constant 0 : index
      %c0_12 = arith.constant 0 : index
      %28 = vector.load %arg6[%c0_11, %c0_12] : memref<8x128xf32, #tpu.memory_space<vmem>>, vector<8x128xf32>
      tpu.vector_store %arg6[%c0_11, %c0_12], %27 {strides = array<i32>} : memref<8x128xf32, #tpu.memory_space<vmem>>, vector<8x128xf32>,
    } else {
    }
    %c0 = arith.constant 0 : index
    %c0_1 = arith.constant 0 : index
    %3 = vector.load %arg2[%c0, %c0_1] : memref<8x128xf32, #tpu.memory_space<vmem>>, vector<8x128xf32>
    %c0_2 = arith.constant 0 : index
    %c0_3 = arith.constant 0 : index
    %4 = vector.load %arg3[%c0_2, %c0_3] : memref<3x128xf32, #tpu.memory_space<vmem>>, vector<3x128xf32>
    %c0_4 = arith.constant 0 : index
    %c0_5 = arith.constant 0 : index
    %5 = vector.load %arg6[%c0_4, %c0_5] : memref<8x128xf32, #tpu.memory_space<vmem>>, vector<8x128xf32>
    %6 = tpu.concatenate %5, %3 in 0 : vector<8x128xf32>, vector<8x128xf32> -> vector<16x128xf32>
    %7 = vector.extract_strided_slice %4 {offsets = [2, 0], sizes = [1, 128], strides = [1, 1]} : vector<3x128xf32> to vector<1x128xf32>
    %8 = vector.broadcast %7 : vector<1x128xf32> to vector<8x128xf32>
    %9 = arith.mulf %3, %8 : vector<8x128xf32>
    %c0_6 = arith.constant 0 : index
    %c0_7 = arith.constant 0 : index
    %10 = vector.load %arg4[%c0_6, %c0_7] : memref<1x128xf32, #tpu.memory_space<vmem>>, vector<1x128xf32>
    %11 = vector.broadcast %10 : vector<1x128xf32> to vector<8x128xf32>
    %12 = arith.addf %9, %11 : vector<8x128xf32>
    %13 = vector.extract_strided_slice %6 {offsets = [4, 0], sizes = [8, 128], strides = [1, 1]} : vector<16x128xf32> to vector<8x128xf32>
    %14 = vector.extract_strided_slice %4 {offsets = [0, 0], sizes = [1, 128], strides = [1, 1]} : vector<3x128xf32> to vector<1x128xf32>
    %15 = vector.broadcast %14 : vector<1x128xf32> to vector<8x128xf32>
    %16 = arith.mulf %13, %15 : vector<8x128xf32>
    %17 = arith.addf %12, %16 : vector<8x128xf32>
    %18 = vector.extract_strided_slice %6 {offsets = [6, 0], sizes = [8, 128], strides = [1, 1]} : vector<16x128xf32> to vector<8x128xf32>
    %19 = vector.extract_strided_slice %4 {offsets = [1, 0], sizes = [1, 128], strides = [1, 1]} : vector<3x128xf32> to vector<1x128xf32>
    %20 = vector.broadcast %19 : vector<1x128xf32> to vector<8x128xf32>
    %21 = arith.mulf %18, %20 : vector<8x128xf32>
    %22 = arith.addf %17, %21 : vector<8x128xf32>
    %c0_8 = arith.constant 0 : index
    %c0_9 = arith.constant 0 : index
    %23 = vector.load %arg5[%c0_8, %c0_9] : memref<8x128xf32, #tpu.memory_space<vmem>>, vector<8x128xf32>
    tpu.vector_store %arg5[%c0_8, %c0_9], %22 {strides = array<i32>} : memref<8x128xf32, #tpu.memory_space<vmem>>, vector<8x128xf32>,
    %c1_i32 = arith.constant 1 : i32
    %24 = arith.cmpi ne, %arg1, %c1_i32 : i32
    %25 = arith.extui %24 : i1 to i32
    %c0_i32_10 = arith.constant 0 : i32
    %26 = arith.cmpi ne, %25, %c0_i32_10 : i32
    scf.if %26 {
      %27 = vector.extract_strided_slice %3 {offsets = [4, 0], sizes = [4, 128], strides = [1, 1]} : vector<8x128xf32> to vector<4x128xf32>
      %c4 = arith.constant 4 : index
      %c0_11 = arith.constant 0 : index
      %28 = vector.load %arg6[%c4, %c0_11] : memref<8x128xf32, #tpu.memory_space<vmem>>, vector<4x128xf32>
      tpu.vector_store %arg6[%c4, %c0_11], %27 {strides = array<i32>} : memref<8x128xf32, #tpu.memory_space<vmem>>, vector<4x128xf32>,
    } else {
    }
    return
  }
  func.func @transform_0(%arg0: i32, %arg1: i32) -> (i32, i32) {
    %c0_i32 = arith.constant 0 : i32
    return %arg1, %arg0 : i32, i32
  }
  func.func @transform_1(%arg0: i32, %arg1: i32) -> (i32, i32) {
    %c0_i32 = arith.constant 0 : i32
    %c0_i32_0 = arith.constant 0 : i32
    return %c0_i32, %arg0 : i32, i32
  }
  func.func @transform_2(%arg0: i32, %arg1: i32) -> (i32, i32) {
    %c0_i32 = arith.constant 0 : i32
    %c0_i32_0 = arith.constant 0 : i32
    return %c0_i32, %arg0 : i32, i32
  }
  func.func @transform_3(%arg0: i32, %arg1: i32) -> (i32, i32) {
    %c0_i32 = arith.constant 0 : i32
    return %arg1, %arg0 : i32, i32
  }
}

</mosaic_0001>

<bundles_post_ra>
// kernel: tpu_custom_call.1
= control target key start
LH: loop header
LB: loop body
LE: loop exit
PB: predicated region body
PF: predicated region fallthrough
CT: control target
= control target key end

     0   :  { %8 = vsyncpa [#allocation4], 0  ;;  %s838_s0 = inlined_call_operand.hbm [shape: f32[16,128], index: 0, kind: input, shape index: {}]   ;;  %s839_s1 = inlined_call_operand.hbm [shape: f32[3,128], index: 1, kind: input, shape index: {}]   ;;  %s840_s2 = inlined_call_operand.vmem [shape: f32[1,128], index: 2, kind: input, shape index: {}]   ;;  %s841_s3 = inlined_call_operand.hbm [shape: f32[16,128], index: 3, kind: output, shape index: {}]  }
   0x1   :  { %10 = vsyncpa [#allocation4 + $0x1], 0 }
   0x2   :  { %11 = vsyncpa [#allocation7], 0 }
   0x3   :  { %12 = vsyncpa [#allocation5], 0 }
   0x4   :  { %14 = vsyncpa [#allocation5 + $0x1], 0  ;;  %s668_s12 = smov 0   ;;  %s670_s13 = smov 0  }
   0x5   :  { %s672_s14 = smov 0   ;;  %s674_s15 = smov 0  }
   0x6   :  { %s676_s16 = smov 0   ;;  %s678_s17 = smov 0  }
   0x7 LB: > { %s411_s18 = sadd.s32 4294967295, %s642_s17   ;;  %s412_s19 = sadd.s32 4294967294, %s642_s17   ;;  %s642_s17 = sphi %s678_s17, %s20_s17   ;;  %s638_s16 = sphi %s676_s16, %s858_s16   ;;  %s634_s15 = sphi %s674_s15, %s857_s15   ;;  %s630_s14 = sphi %s672_s14, %s856_s14   ;;  %s626_s13 = sphi %s670_s13, %s855_s13   ;;  %s622_s12 = sphi %s668_s12, %s854_s12  }
   0x8   : > { %p54_p0 = scmp.ne.s32.totalorder %s626_s13, %s622_s12  ;;  %p702_p1 = scmp.eq.s32.totalorder %s411_s18, 0 }
   0x9   : > { %p706_p2 = scmp.eq.s32.totalorder %s411_s18, 1  ;;  %p138_p3 = scmp.eq.s32.totalorder %s412_s19, 1 }
   0xa   : > { %p712_p4 = por %p702_p1, %p54_p0  ;;  %p413_p5 = scmp.ge.s32.totalorder %s642_s17, 1 }
   0xb   : > { %p717_p6 = por %p138_p3, %p54_p0  ;;  %p145_p7 = scmp.lt.s32.totalorder %s642_s17, 3 }
   0xc   : > { %s845_s22 = scalar_select %p712_p4, 1, 0 }
   0xd   : > { %s846_s23 = scalar_select %p717_p6, 1, 0 }
   0xe   : > { %p722_p8 = pnand %p413_p5, %p145_p7  ;;  %s644_s25 = smov [#allocation6]  }
   0xf   : > { %s160_s26 = sshll.u32 %s644_s25, 4  ;;  %s29_s28 = sadd.s32 1, %s638_s16  ;;  %s161_s26 = int_to_ptr.vmem [resolvable:$true] %s160_s26 }
  0x10   : > { %p438_p10 = pneg %p722_p8  ;;  %s41_s29 = sadd.s32 1, %s630_s14 }
  0x11   : > { %p30_p12 = scmp.ge.s32.totalorder %s29_s28, 2  ;;  %s515_s30 = scalar_lea.vmem %s161_s26, 64 }
  0x12   : > { %p731_p11 = pnand %p438_p10, %p702_p1  ;;  %p516_p0 = scmp.ne.s32.totalorder %s161_s26, %s515_s30 }
  0x13   : > { %p523_p7 = scmp.lt.s32.totalorder %s161_s26, %s161_s26  ;;  %p524_p6 = scmp.lt.s32.totalorder %s515_s30, %s515_s30 }
  0x14   : > { %p506_p13 = pneg %p731_p11 }
  0x15   : > { %p525_p9 = por %p524_p6, %p523_p7 }
  0x16   : > { %p518_p3 = pnand %p516_p0, %p506_p13 }
  0x18   : > { %p519_p5 = pneg %p518_p3 }
  0x1a   : > { %p526_p4 = pnand %p525_p9, %p519_p5 }
  0x1c   : > { %529 = shalt.err (!%p526_p4)
}
  0x1d   : > { %441 = dma.hbm_to_vmem [thread:$0]  (!%p731_p11), %s839_s1, 64, %s161_s26, [#allocation7]  }
  0x1e   : > { %s860_s28 = smov (%p30_p12, %s29_s28), 0  ;;  %p48_p6 = scmp.ne.s32.totalorder %s630_s14, %s626_s13 }
  0x1f   : > { %p49_p4 = scmp.eq.s32.totalorder %s642_s17, 0  ;;  %s36_s6 = ssub.s32 %s638_s16, %s860_s28 }
  0x20   : > { %p451_p9 = scmp.lt.s32.totalorder %s642_s17, 2  ;;  %p39_p10 = scmp.eq.s32.totalorder %s36_s6, 0 }
  0x21   : > { %p50_p13 = por %p49_p4, %p48_p6  ;;  %p754_p0 = por %p706_p2, %p48_p6 }
  0x22   : > { %s177_s8 = sand.u32 1, %s630_s14   ;;  %s418_s11 = sshll.u32 %s638_s16, 7 }
  0x23   : > { %s760_s9 = scalar_select %p39_p10, %s630_s14, %s41_s29  }
  0x24   : > { %s417_s10 = sshll.u32 %s177_s8, 3  ;;  %s187_s25 = scalar_lea.hbm %s838_s0, %s418_s11 }
  0x25   : > { %s181_s26 = scalar_lea.vmem [#allocation3], %s417_s10  ;;  %p766_p11 = pnand %p451_p9, %p50_p13 }
  0x26   : > { %s189_s27 = sshll.u32 %s181_s26, 4  ;;  %s178_s21 = scalar_lea.sflag [#allocation4], %s177_s8  ;;  %s190_s27 = int_to_ptr.vmem [resolvable:$true] %s189_s27 }
  0x27   : > { %p532_p2 = pneg %p766_p11  ;;  %s543_s4 = scalar_lea.vmem %s190_s27, 128 }
  0x28   : > { %p544_p12 = scmp.ne.s32.totalorder %s190_s27, %s543_s4  ;;  %s645_s29 = smov [#allocation3]  }
  0x29   : > { %s548_s5 = sshll.u32 %s645_s29, 4  ;;  %s549_s5 = int_to_ptr.vmem [resolvable:$false] %s548_s5 }
  0x2a   : > { %p546_p3 = pnand %p544_p12, %p532_p2  ;;  %s550_s6 = scalar_lea.vmem %s549_s5, 256 }
  0x2b   : > { %p551_p7 = scmp.lt.s32.totalorder %s190_s27, %s549_s5  ;;  %p552_p6 = scmp.lt.s32.totalorder %s550_s6, %s543_s4 }
  0x2c   : > { %p547_p5 = pneg %p546_p3 }
  0x2d   : > { %p553_p4 = por %p552_p6, %p551_p7 }
  0x2f   : > { %p554_p10 = pnand %p553_p4, %p547_p5 }
  0x31   : > { %557 = shalt.err (!%p554_p10)
}
  0x32   : > { %445 = dma.hbm_to_vmem [thread:$0]  (!%p766_p11), %s187_s25, 128, %s190_s27, %s178_s21  }
  0x33   : > { %198 = sbr.rel (%p722_p8) target bundleno = 110 (0x6e), region = 32  ;;  %s777_s8 = sand.u32 (!%p722_p8), 1, %s626_s13  }
  0x34   : > { %s420_s10 = sshll.u32 (!%p722_p8), %s777_s8, 3  ;;  %s201_s11 = scalar_lea.sflag (!%p722_p8), [#allocation4], %s777_s8 }
  0x35   : > { %s204_s18 = scalar_lea.vmem (!%p722_p8), [#allocation3], %s420_s10  ;;  %p851_p9 = scmp.ne.s32.totalorder (!%p722_p8), %s845_s22, 0 }
  0x38   : > { %609 = dma.done.wait (%p851_p9), %s201_s11, 128  }
  0x39   : > { %611 = vsyncadd (%p851_p9), %s201_s11, 4294967168 }
  0x3a   : > { %613 = dma.done.wait (%p702_p1), [#allocation7], 64  }
  0x3b   : > { %615 = vsyncadd (%p702_p1), [#allocation7], 4294967232  ;;  %s789_s24 = scalar_lea.vmem [#allocation8], %s420_s10  ;;  %p423_p8 = scmp.ne.s32.totalorder %s634_s15, 0 }
  0x3d   : > { %240 = sbr.rel (%p423_p8) target bundleno = 68 (0x44), region = 44 }
  0x42   : > { %v646_v0 = vmov 0.0  }
  0x43   : > { %241 = vst [vmem:[#allocation2] sm:$0xff] %v646_v0 }
  0x44 PF: > { %v245_v1 = vlaneseq  ;;  %v243_v3 = vld [vmem:[#allocation6] sm:$0x7]  ;;  %v242_v7 = vld [vmem:[%s204_s18] sm:$0xff]  ;;  %v424_v12 = vld [vmem:[%s840_s2] ss:$0 sm:$0xff]  ;;  %vm266_vm0 = vcmask 1043456  }
  0x45   : > { %vm280_vm1 = vcmask 1041408   ;;  %p425_p1 = scmp.eq.s32.totalorder %s634_s15, 1 }
  0x46   : > { %v246_v2 = vshrl.u32 %v245_v1, 7 }
  0x48   : > { %v247_v4 = vsub.s32 2, %v246_v2  ;;  %v260_v5 = vsub.s32 0, %v246_v2  ;;  %v274_v6 = vsub.s32 1, %v246_v2 }
  0x4a   : > { %v244_v8 = vld [vmem:[#allocation2] sm:$0xff]  ;;  %v248_v9 = vrot.slane %v243_v3, %v247_v4  ;;  %v261_v10 = vrot.slane %v243_v3, %v260_v5  ;;  %v275_v11 = vrot.slane %v243_v3, %v274_v6 }
  0x4c   : > { %v249_v13 = vmul.f32 %v248_v9, %v242_v7  ;;  %v262_v14 = vmul.f32 %v261_v10, %v244_v8  ;;  %v263_v15 = vmul.f32 %v261_v10, %v242_v7  ;;  %v276_v16 = vmul.f32 %v275_v11, %v244_v8 }
  0x4d   : > { %v277_v17 = vmul.f32 %v275_v11, %v242_v7 }
  0x4e   : > { %v257_v18 = vadd.f32 %v424_v12, %v249_v13  ;;  %v267_v19 = vrot.slane %v262_v14, 4  ;;  %v268_v20 = vrot.slane %v263_v15, 4  ;;  %v281_v21 = vrot.slane %v276_v16, 6 }
  0x4f   : > { %v282_v22 = vrot.slane %v277_v17, 6 }
  0x50   : > { %v269_v23 = vsel %vm266_vm0, %v267_v19, %v268_v20 }
  0x51   : > { %v271_v24 = vadd.f32 %v269_v23, %v257_v18  ;;  %v283_v25 = vsel %vm280_vm1, %v281_v21, %v282_v22  ;;  %290 = sbr.rel (%p425_p1) target bundleno = 87 (0x57), region = 48 }
  0x53   : > { %v285_v26 = vadd.f32 %v283_v25, %v271_v24 }
  0x55   : > { %286 = vst [vmem:[%s789_s24] sm:$0xff] %v285_v26 }
  0x56   : > { %291 = vst [vmem:[#allocation2] sm:$0xf0] %v242_v7 }
  0x57 PF: > { %s427_s19 = sshll.u32 %s634_s15, 7  ;;  %s307_s30 = sshll.u32 %s789_s24, 4  ;;  %s308_s30 = int_to_ptr.vmem [resolvable:$true] %s307_s30 }
  0x58   : > { %s305_s27 = scalar_lea.hbm %s841_s3, %s427_s19  ;;  %s293_s21 = scalar_lea.sflag [#allocation5], %s777_s8 }
  0x59   : > { %s558_s4 = scalar_lea.vmem %s308_s30, 128  ;;  %s647_s29 = smov [#allocation8]  }
  0x5a   : > { %p559_p13 = scmp.ne.s32.totalorder %s308_s30, %s558_s4  ;;  %s562_s5 = sshll.u32 %s647_s29, 4  ;;  %s563_s5 = int_to_ptr.vmem [resolvable:$false] %s562_s5 }
  0x5b   : > { %s564_s6 = scalar_lea.vmem %s563_s5, 256  ;;  %p565_p12 = scmp.lt.s32.totalorder %s308_s30, %s563_s5 }
  0x5c   : > { %p560_p11 = pnand %p559_p13, %p754_p0  ;;  %p566_p3 = scmp.lt.s32.totalorder %s564_s6, %s558_s4 }
  0x5e   : > { %p561_p2 = pneg %p560_p11  ;;  %p567_p5 = por %p566_p3, %p565_p12 }
  0x60   : > { %p568_p7 = pnand %p567_p5, %p561_p2 }
  0x62   : > { %571 = shalt.err (!%p568_p7)
}
  0x63   : > { %s572_s15 = scalar_lea.hbm %s305_s27, 128  ;;  %s576_s11 = scalar_lea.hbm %s841_s3, 256 }
  0x64   : > { %p573_p6 = scmp.ne.s32.totalorder %s305_s27, %s572_s15  ;;  %p577_p9 = scmp.lt.s32.totalorder %s305_s27, %s841_s3 }
  0x65   : > { %p578_p8 = scmp.lt.s32.totalorder %s576_s11, %s572_s15 }
  0x66   : > { %p574_p4 = pnand %p573_p6, %p754_p0 }
  0x67   : > { %p579_p1 = por %p578_p8, %p577_p9 }
  0x68   : > { %p575_p10 = pneg %p574_p4 }
  0x6a   : > { %p580_p13 = pnand %p579_p1, %p575_p10 }
  0x6c   : > { %583 = shalt.err (!%p580_p13)
}
  0x6d   : > { %436 = dma.vmem_to_hbm [thread:$0]  (%p754_p0), %s308_s30, 128, %s305_s27, %s293_s21  }
  0x6e PF: > { %s319_s20 = sand.u32 1, %s622_s12   ;;  %p852_p11 = scmp.ne.s32.totalorder %s846_s23, 0 }
  0x6f   : > { %p853_p2 = scmp.ge.s32.totalorder %s642_s17, 2  ;;  %s320_s22 = scalar_lea.sflag [#allocation5], %s319_s20 }
  0x71   : > { %p447_p12 = pnand %p853_p2, %p852_p11 }
  0x73   : > { %p448_p3 = pneg %p447_p12 }
  0x75   : > { %617 = dma.done.wait (%p448_p3), %s320_s22, 128  }
  0x76   : > { %619 = vsyncadd (%p448_p3), %s320_s22, 4294967168  ;;  %s20_s17 = sadd.s32 1, %s642_s17   ;;  %s854_s12 = smov %s626_s13 }
  0x77   : > { %p17_p5 = scmp.ge.s32.totalorder %s20_s17, 4   ;;  %s855_s13 = smov %s630_s14 }
  0x78   : > { %s856_s14 = smov %s760_s9  ;;  %s857_s15 = smov %s638_s16 }
  0x79   : > { %s858_s16 = smov %s860_s28  ;;  %19 = sbr.rel (!%p17_p5) target bundleno = 7 (0x7), region = 93 }
  0x7e   :  { %325 = vsyncpa [#allocation4], 1 }
  0x7f   :  { %327 = vsyncpa [#allocation4 + $0x1], 1 }
  0x80   :  { %328 = vsyncpa [#allocation7], 1 }
  0x81   :  { %329 = vsyncpa [#allocation5], 1 }
  0x82   :  { %331 = vsyncpa [#allocation5 + $0x1], 1 }

</bundles_post_ra>
